<compile_context>
chip_gen: v6e
topology: v6e:2x2x1
jax: 0.10.0
libtpu: 0.0.40
codegen_flags: <defaults>
</compile_context>

<pallas_src>
import math
from functools import partial

import numpy as np
import jax
import jax.numpy as jnp
from jax.experimental import pallas as pl
from jax.experimental.pallas import tpu as pltpu


_MASK_VALUE = -1e30  # finite "-inf" (plays the role of the fp16-min additive mask)


def _flash_kernel(q_ref, k_ref, v_ref, o_ref, qs_ref, m_ref, l_ref, acc_ref, *,
                  scale, past_len, q_tile, kv_tile, compute_dtype):
    """One (head-group, q-tile) online-softmax step over one kv tile.

    q_ref  : (1, Hb, tq, D)  query tile
    k_ref  : (1, Hb, tk, D)  key tile straight out of the cache
    v_ref  : (1, Hb, tk, D)  value tile straight out of the cache
    o_ref  : (1, Hb, tq, D)  output tile (written on the last kv step)
    qs_ref : (Hb, tq, D)     scratch: pre-scaled / pre-cast Q
    m_ref  : (Hb, tq, 1)     scratch: running row max
    l_ref  : (Hb, tq, 1)     scratch: running softmax denominator
    acc_ref: (Hb, tq, D)     scratch: running (unnormalized) output
    """
    qi = pl.program_id(1)
    j = pl.program_id(2)

    @pl.when(j == 0)
    def _init():
        # Fold the 1/sqrt(D) scale into Q once per q tile: O(tq*D), not O(tq*Lk).
        qs_ref[...] = (q_ref[0] * scale).astype(compute_dtype)
        m_ref[...] = jnp.full_like(m_ref, -jnp.inf)
        l_ref[...] = jnp.zeros_like(l_ref)
        acc_ref[...] = jnp.zeros_like(acc_ref)

    # Skip kv tiles that lie entirely in the causal future of this q tile
    # (also skips tiles fully beyond past_len + q_len).
    last_q_pos = past_len + qi * q_tile + (q_tile - 1)

    @pl.when(j * kv_tile <= last_q_pos)
    def _compute():
        q = qs_ref[...]                                    # (Hb, tq, D)
        k = k_ref[0].astype(compute_dtype)                 # (Hb, tk, D)
        v = v_ref[0].astype(compute_dtype)                 # (Hb, tk, D)

        # S = Q K^T in NT form (contract last dims) -> no explicit transpose.
        s = jax.lax.dot_general(
            q, k, (((2,), (2,)), ((0,), (0,))),
            preferred_element_type=jnp.float32)            # (Hb, tq, tk)

        # Causal mask generated in-kernel (== ExLlama's additive buffer mask).
        q_pos = past_len + qi * q_tile + jax.lax.broadcasted_iota(
            jnp.int32, (1, q_tile, kv_tile), 1)
        k_pos = j * kv_tile + jax.lax.broadcasted_iota(
            jnp.int32, (1, q_tile, kv_tile), 2)
        s = jnp.where(k_pos <= q_pos, s, _MASK_VALUE)

        # Online softmax update.
        m_prev = m_ref[...]
        m_new = jnp.maximum(m_prev, jnp.max(s, axis=-1, keepdims=True))
        alpha = jnp.exp(m_prev - m_new)
        p = jnp.exp(s - m_new)                             # (Hb, tq, tk)
        l_ref[...] = alpha * l_ref[...] + jnp.sum(p, axis=-1, keepdims=True)
        pv = jax.lax.dot_general(
            p.astype(compute_dtype), v, (((2,), (1,)), ((0,), (0,))),
            preferred_element_type=jnp.float32)            # (Hb, tq, D)
        acc_ref[...] = alpha * acc_ref[...] + pv
        m_ref[...] = m_new

    @pl.when(j == pl.num_programs(2) - 1)
    def _finalize():
        # Normalize after the PV matmuls (O(tq*D)); approx reciprocal -> EUP slot.
        inv_l = pl.reciprocal(l_ref[...], approx=True)
        o_ref[0] = (acc_ref[...] * inv_l).astype(o_ref.dtype)


def flash_attention_from_cache(q, cache_k, cache_v, *, past_len, kv_tile=512,
                               q_tile=256, head_block=None, compute_dtype=None):
    """q: (bsz, H, Lq, D); cache_k/v: (bsz, H, max_seq, D), already updated.

    Computes softmax(Q K[:kv_len]^T / sqrt(D) + causal_mask) @ V[:kv_len]
    without slicing or copying the cache: the kv grid axis only visits the
    first ceil(kv_len/kv_tile) tiles and the in-kernel causal mask hides any
    position >= kv_len.
    """
    bsz, H, Lq, D = q.shape
    max_seq = cache_k.shape[2]
    kv_len = past_len + Lq
    assert kv_len <= max_seq

    if compute_dtype is None:
        compute_dtype = q.dtype          # pass jnp.bfloat16 for bf16/f16 models
    if head_block is None:
        head_block = next(h for h in (8, 4, 2, 1) if H % h == 0)
    assert H % head_block == 0
    Hb = head_block
    G = (bsz * H) // Hb                  # heads batched per grid step

    tq = min(q_tile, Lq)
    if Lq % tq != 0:
        tq = Lq   # TODO(synk): pad Q for ragged Lq instead of a single q tile.
    tk = min(kv_tile, max_seq)
    if max_seq % tk != 0:
        tk = max_seq  # TODO(synk): pad the cache length instead of one big kv tile.
    n_q = Lq // tq
    n_kv = pl.cdiv(kv_len, tk)

    # Leading-dim reshapes only (no data movement): fold (bsz, H) -> (G, Hb).
    qg = q.reshape(G, Hb, Lq, D)
    kg = cache_k.reshape(G, Hb, max_seq, D)
    vg = cache_v.reshape(G, Hb, max_seq, D)

    kernel = partial(_flash_kernel, scale=1.0 / math.sqrt(D), past_len=past_len,
                     q_tile=tq, kv_tile=tk, compute_dtype=compute_dtype)

    out = pl.pallas_call(
        kernel,
        out_shape=jax.ShapeDtypeStruct((G, Hb, Lq, D), q.dtype),
        grid=(G, n_q, n_kv),
        in_specs=[
            pl.BlockSpec((1, Hb, tq, D), lambda g, qi, j: (g, 0, qi, 0)),  # Q
            pl.BlockSpec((1, Hb, tk, D), lambda g, qi, j: (g, 0, j, 0)),   # K cache
            pl.BlockSpec((1, Hb, tk, D), lambda g, qi, j: (g, 0, j, 0)),   # V cache
        ],
        out_specs=pl.BlockSpec((1, Hb, tq, D), lambda g, qi, j: (g, 0, qi, 0)),
        scratch_shapes=[
            pltpu.VMEM((Hb, tq, D), compute_dtype),   # pre-scaled Q
            pltpu.VMEM((Hb, tq, 1), jnp.float32),     # running max
            pltpu.VMEM((Hb, tq, 1), jnp.float32),     # running denominator
            pltpu.VMEM((Hb, tq, D), jnp.float32),     # running output accumulator
        ],
        compiler_params=pltpu.CompilerParams(
            dimension_semantics=("parallel", "parallel", "arbitrary")),
    )(qg, kg, vg)

    return out.reshape(bsz, H, Lq, D)


@partial(jax.jit,
         static_argnames=("past_len", "num_heads", "head_dim", "kv_tile",
                          "q_tile", "head_block", "compute_dtype"),
         donate_argnums=(1, 2))
def exllama_attention_forward(hidden_states, cache_k, cache_v, *, past_len,
                              num_heads, head_dim, kv_tile=512, q_tile=256,
                              head_block=None, compute_dtype=None):
    """Mirrors ExLlamaAttention.forward for one layer (Ex4bitLinear == identity).

    cache_k / cache_v are donated so the q_len-row insert is done in place
    instead of round-tripping the whole cache through HBM every layer.
    Returns (attn_output, new_cache_k, new_cache_v).
    """
    bsz, q_len, hidden = hidden_states.shape
    assert hidden == num_heads * head_dim

    # Identity projections => Q == new K == new V.  This transpose into the
    # head-major cache layout is required for the cache write anyway; the only
    # extra activation shuffle outside the kernel is the output transpose below.
    qkv = jnp.swapaxes(
        hidden_states.reshape(bsz, q_len, num_heads, head_dim), 1, 2)  # (b,H,Lq,D)

    # cache.key_states[i].narrow(2, past_len, q_len).copy_(key_states)
    cache_k = jax.lax.dynamic_update_slice(
        cache_k, qkv.astype(cache_k.dtype), (0, 0, past_len, 0))
    cache_v = jax.lax.dynamic_update_slice(
        cache_v, qkv.astype(cache_v.dtype), (0, 0, past_len, 0))

    attn = flash_attention_from_cache(
        qkv, cache_k, cache_v, past_len=past_len, kv_tile=kv_tile,
        q_tile=q_tile, head_block=head_block, compute_dtype=compute_dtype)

    # (b, H, Lq, D) -> (b, Lq, hidden).  o_proj is identity.
    attn = jnp.swapaxes(attn, 1, 2).reshape(bsz, q_len, hidden)
    return attn, cache_k, cache_v


def _reference_forward(hidden_states, cache_k, cache_v, past_len, num_heads, head_dim):
    """Pure-JAX reference of the same forward (explicit additive causal mask)."""
    bsz, q_len, hidden = hidden_states.shape
    qkv = jnp.swapaxes(
        hidden_states.reshape(bsz, q_len, num_heads, head_dim), 1, 2)
    ck = cache_k.at[:, :, past_len:past_len + q_len, :].set(qkv.astype(cache_k.dtype))
    cv = cache_v.at[:, :, past_len:past_len + q_len, :].set(qkv.astype(cache_v.dtype))
    kv_len = past_len + q_len
    k = ck[:, :, :kv_len, :]
    v = cv[:, :, :kv_len, :]
    scale = 1.0 / math.sqrt(head_dim)
    s = jnp.einsum("bhqd,bhkd->bhqk", qkv, k).astype(jnp.float32) * scale
    q_pos = past_len + jnp.arange(q_len)[:, None]
    k_pos = jnp.arange(kv_len)[None, :]
    s = jnp.where(k_pos <= q_pos, s, -jnp.inf)   # ExLlama's causal buffer mask
    p = jax.nn.softmax(s, axis=-1)
    o = jnp.einsum("bhqk,bhkd->bhqd", p.astype(v.dtype), v)
    return jnp.swapaxes(o, 1, 2).reshape(bsz, q_len, hidden), ck, cv


if __name__ == "__main__":
    bsz = 2
    q_len = 8
    num_heads = 4
    head_dim = 8
    hidden_size = num_heads * head_dim     # 32
    past_len = 4
    max_seq_len = 32

    key = jax.random.PRNGKey(0)
    k1, k2, k3 = jax.random.split(key, 3)
    hidden_states = jax.random.normal(k1, (bsz, q_len, hidden_size), dtype=jnp.float32)
    cache_k = jax.random.normal(k2, (bsz, num_heads, max_seq_len, head_dim),
                                dtype=jnp.float32)
    cache_v = jax.random.normal(k3, (bsz, num_heads, max_seq_len, head_dim),
                                dtype=jnp.float32)

    # Host copies for the reference: the device cache arrays are donated below.
    cache_k0 = np.asarray(cache_k)
    cache_v0 = np.asarray(cache_v)

    out, new_ck, new_cv = exllama_attention_forward(
        hidden_states, cache_k, cache_v,
        past_len=past_len, num_heads=num_heads, head_dim=head_dim,
        kv_tile=8)   # small kv tile so the demo exercises multiple flash steps
    out = jax.block_until_ready(out)

    ref_out, ref_ck, ref_cv = _reference_forward(
        hidden_states, jnp.asarray(cache_k0), jnp.asarray(cache_v0),
        past_len, num_heads, head_dim)

    assert out.shape == (bsz, q_len, hidden_size)
    assert jnp.allclose(new_ck, ref_ck) and jnp.allclose(new_cv, ref_cv)
    # f32 MXU operands; only the approximate reciprocal differs from the reference.
    assert jnp.allclose(out, ref_out, atol=1e-2, rtol=1e-2)

    print("KERNEL_OK")
</pallas_src>

<mosaic_0001>
module attributes {stable_mosaic.version = 11 : i64} {
  func.func @_flash_kernel(%arg0: i32, %arg1: i32, %arg2: i32, %arg3: memref<1x4x8x8xf32, #tpu.memory_space<vmem>>, %arg4: memref<1x4x8x8xf32, #tpu.memory_space<vmem>>, %arg5: memref<1x4x8x8xf32, #tpu.memory_space<vmem>>, %arg6: memref<1x4x8x8xf32, #tpu.memory_space<vmem>>, %arg7: memref<4x8x8xf32, #tpu.memory_space<vmem>>, %arg8: memref<4x8x1xf32, #tpu.memory_space<vmem>>, %arg9: memref<4x8x1xf32, #tpu.memory_space<vmem>>, %arg10: memref<4x8x8xf32, #tpu.memory_space<vmem>>) attributes {dimension_semantics = [#tpu.dimension_semantics<parallel>, #tpu.dimension_semantics<parallel>, #tpu.dimension_semantics<arbitrary>], iteration_bounds = array<i64: 2, 1, 2>, scalar_prefetch = 0 : i64, scratch_operands = 4 : i64, tpu.core_type = #tpu.core_type<tc>, window_params = [{transform_indices = @transform_0, window_bounds = array<i64: 1, 4, 8, 8>}, {transform_indices = @transform_1, window_bounds = array<i64: 1, 4, 8, 8>}, {transform_indices = @transform_2, window_bounds = array<i64: 1, 4, 8, 8>}, {transform_indices = @transform_3, window_bounds = array<i64: 1, 4, 8, 8>}]} {
    %c0_i32 = arith.constant 0 : i32
    %0 = arith.cmpi eq, %arg2, %c0_i32 : i32
    %1 = arith.extui %0 : i1 to i32
    %c0_i32_0 = arith.constant 0 : i32
    %2 = arith.cmpi ne, %1, %c0_i32_0 : i32
    scf.if %2 {
      %c0 = arith.constant 0 : index
      %c0_4 = arith.constant 0 : index
      %c0_5 = arith.constant 0 : index
      %c0_6 = arith.constant 0 : index
      %13 = vector.load %arg3[%c0, %c0_4, %c0_5, %c0_6] : memref<1x4x8x8xf32, #tpu.memory_space<vmem>>, vector<1x4x8x8xf32>
      %14 = vector.shape_cast %13 : vector<1x4x8x8xf32> to vector<4x8x8xf32>
      %cst = arith.constant 0.353553385 : f32
      %15 = vector.broadcast %cst : f32 to vector<4x8x8xf32>
      %16 = arith.mulf %14, %15 : vector<4x8x8xf32>
      %c0_7 = arith.constant 0 : index
      %c0_8 = arith.constant 0 : index
      %c0_9 = arith.constant 0 : index
      %17 = vector.load %arg7[%c0_7, %c0_8, %c0_9] : memref<4x8x8xf32, #tpu.memory_space<vmem>>, vector<4x8x8xf32>
      tpu.vector_store %arg7[%c0_7, %c0_8, %c0_9], %16 {strides = array<i32>} : memref<4x8x8xf32, #tpu.memory_space<vmem>>, vector<4x8x8xf32>,
      %cst_10 = arith.constant 0xFF800000 : f32
      %18 = vector.broadcast %cst_10 : f32 to vector<4x8x1xf32>
      %c0_11 = arith.constant 0 : index
      %c0_12 = arith.constant 0 : index
      %c0_13 = arith.constant 0 : index
      %19 = vector.load %arg8[%c0_11, %c0_12, %c0_13] : memref<4x8x1xf32, #tpu.memory_space<vmem>>, vector<4x8x1xf32>
      tpu.vector_store %arg8[%c0_11, %c0_12, %c0_13], %18 {strides = array<i32>} : memref<4x8x1xf32, #tpu.memory_space<vmem>>, vector<4x8x1xf32>,
      %cst_14 = arith.constant 0.000000e+00 : f32
      %20 = vector.broadcast %cst_14 : f32 to vector<4x8x1xf32>
      %c0_15 = arith.constant 0 : index
      %c0_16 = arith.constant 0 : index
      %c0_17 = arith.constant 0 : index
      %21 = vector.load %arg9[%c0_15, %c0_16, %c0_17] : memref<4x8x1xf32, #tpu.memory_space<vmem>>, vector<4x8x1xf32>
      tpu.vector_store %arg9[%c0_15, %c0_16, %c0_17], %20 {strides = array<i32>} : memref<4x8x1xf32, #tpu.memory_space<vmem>>, vector<4x8x1xf32>,
      %cst_18 = arith.constant 0.000000e+00 : f32
      %22 = vector.broadcast %cst_18 : f32 to vector<4x8x8xf32>
      %c0_19 = arith.constant 0 : index
      %c0_20 = arith.constant 0 : index
      %c0_21 = arith.constant 0 : index
      %23 = vector.load %arg10[%c0_19, %c0_20, %c0_21] : memref<4x8x8xf32, #tpu.memory_space<vmem>>, vector<4x8x8xf32>
      tpu.vector_store %arg10[%c0_19, %c0_20, %c0_21], %22 {strides = array<i32>} : memref<4x8x8xf32, #tpu.memory_space<vmem>>, vector<4x8x8xf32>,
    } else {
    }
    %c8_i32 = arith.constant 8 : i32
    %3 = arith.muli %arg1, %c8_i32 : i32
    %c4_i32 = arith.constant 4 : i32
    %4 = arith.addi %c4_i32, %3 : i32
    %c7_i32 = arith.constant 7 : i32
    %5 = arith.addi %4, %c7_i32 : i32
    %c8_i32_1 = arith.constant 8 : i32
    %6 = arith.muli %arg2, %c8_i32_1 : i32
    %7 = arith.cmpi sle, %6, %5 : i32
    %8 = arith.extui %7 : i1 to i32
    %c0_i32_2 = arith.constant 0 : i32
    %9 = arith.cmpi ne, %8, %c0_i32_2 : i32
    scf.if %9 {
      %c0 = arith.constant 0 : index
      %c0_4 = arith.constant 0 : index
      %c0_5 = arith.constant 0 : index
      %13 = vector.load %arg7[%c0, %c0_4, %c0_5] : memref<4x8x8xf32, #tpu.memory_space<vmem>>, vector<4x8x8xf32>
      %c0_6 = arith.constant 0 : index
      %c0_7 = arith.constant 0 : index
      %c0_8 = arith.constant 0 : index
      %c0_9 = arith.constant 0 : index
      %14 = vector.load %arg4[%c0_6, %c0_7, %c0_8, %c0_9] : memref<1x4x8x8xf32, #tpu.memory_space<vmem>>, vector<1x4x8x8xf32>
      %15 = vector.shape_cast %14 : vector<1x4x8x8xf32> to vector<4x8x8xf32>
      %c0_10 = arith.constant 0 : index
      %c0_11 = arith.constant 0 : index
      %c0_12 = arith.constant 0 : index
      %c0_13 = arith.constant 0 : index
      %16 = vector.load %arg5[%c0_10, %c0_11, %c0_12, %c0_13] : memref<1x4x8x8xf32, #tpu.memory_space<vmem>>, vector<1x4x8x8xf32>
      %17 = vector.shape_cast %16 : vector<1x4x8x8xf32> to vector<4x8x8xf32>
      %cst = arith.constant dense<0.000000e+00> : vector<4x8x8xf32>
      %18 = tpu.matmul %13, %15, %cst {dimension_numbers = #tpu.dot_dimension_numbers<[2], [2], [1], [1], [0, 0, 0, 1, 1, 1], [0], [0]>} : vector<4x8x8xf32>, vector<4x8x8xf32>, vector<4x8x8xf32> -> vector<4x8x8xf32>
      %c8_i32_14 = arith.constant 8 : i32
      %19 = arith.muli %arg1, %c8_i32_14 : i32
      %c4_i32_15 = arith.constant 4 : i32
      %20 = arith.addi %c4_i32_15, %19 : i32
      %21 = tpu.iota {dimensions = array<i32: 1>} : vector<1x8x8xi32>
      %22 = vector.broadcast %20 : i32 to vector<1x8x8xi32>
      %23 = arith.addi %22, %21 : vector<1x8x8xi32>
      %c8_i32_16 = arith.constant 8 : i32
      %24 = arith.muli %arg2, %c8_i32_16 : i32
      %25 = tpu.iota {dimensions = array<i32: 2>} : vector<1x8x8xi32>
      %26 = vector.broadcast %24 : i32 to vector<1x8x8xi32>
      %27 = arith.addi %26, %25 : vector<1x8x8xi32>
      %28 = arith.cmpi sle, %27, %23 : vector<1x8x8xi32>
      %cst_17 = arith.constant -1.000000e+30 : f32
      %29 = vector.shape_cast %28 : vector<1x8x8xi1> to vector<1x8x8xi1>
      %30 = vector.broadcast %29 : vector<1x8x8xi1> to vector<4x8x8xi1>
      %31 = vector.broadcast %cst_17 : f32 to vector<4x8x8xf32>
      %32 = arith.select %30, %18, %31 : vector<4x8x8xi1>, vector<4x8x8xf32>
      %c0_18 = arith.constant 0 : index
      %c0_19 = arith.constant 0 : index
      %c0_20 = arith.constant 0 : index
      %33 = vector.load %arg8[%c0_18, %c0_19, %c0_20] : memref<4x8x1xf32, #tpu.memory_space<vmem>>, vector<4x8x1xf32>
      %cst_21 = arith.constant dense<0xFF800000> : vector<4x8xf32>
      %34 = vector.multi_reduction <maximumf>, %32, %cst_21 [2] : vector<4x8x8xf32> to vector<4x8xf32>
      %35 = vector.shape_cast %34 : vector<4x8xf32> to vector<4x8x1xf32>
      %36 = arith.maximumf %33, %35 : vector<4x8x1xf32>
      %37 = arith.subf %33, %36 : vector<4x8x1xf32>
      %38 = math.exp %37 : vector<4x8x1xf32>
      %39 = vector.broadcast %36 : vector<4x8x1xf32> to vector<4x8x8xf32>
      %40 = arith.subf %32, %39 : vector<4x8x8xf32>
      %41 = math.exp %40 : vector<4x8x8xf32>
      %c0_22 = arith.constant 0 : index
      %c0_23 = arith.constant 0 : index
      %c0_24 = arith.constant 0 : index
      %42 = vector.load %arg9[%c0_22, %c0_23, %c0_24] : memref<4x8x1xf32, #tpu.memory_space<vmem>>, vector<4x8x1xf32>
      %43 = arith.mulf %38, %42 : vector<4x8x1xf32>
      %cst_25 = arith.constant dense<0.000000e+00> : vector<4x8xf32>
      %44 = vector.multi_reduction <add>, %41, %cst_25 [2] : vector<4x8x8xf32> to vector<4x8xf32>
      %45 = vector.shape_cast %44 : vector<4x8xf32> to vector<4x8x1xf32>
      %46 = arith.addf %43, %45 : vector<4x8x1xf32>
      %c0_26 = arith.constant 0 : index
      %c0_27 = arith.constant 0 : index
      %c0_28 = arith.constant 0 : index
      %47 = vector.load %arg9[%c0_26, %c0_27, %c0_28] : memref<4x8x1xf32, #tpu.memory_space<vmem>>, vector<4x8x1xf32>
      tpu.vector_store %arg9[%c0_26, %c0_27, %c0_28], %46 {strides = array<i32>} : memref<4x8x1xf32, #tpu.memory_space<vmem>>, vector<4x8x1xf32>,
      %cst_29 = arith.constant dense<0.000000e+00> : vector<4x8x8xf32>
      %48 = tpu.matmul %41, %17, %cst_29 {dimension_numbers = #tpu.dot_dimension_numbers<[2], [1], [1], [2], [0, 0, 0, 1, 1, 2], [0], [0]>} : vector<4x8x8xf32>, vector<4x8x8xf32>, vector<4x8x8xf32> -> vector<4x8x8xf32>
      %c0_30 = arith.constant 0 : index
      %c0_31 = arith.constant 0 : index
      %c0_32 = arith.constant 0 : index
      %49 = vector.load %arg10[%c0_30, %c0_31, %c0_32] : memref<4x8x8xf32, #tpu.memory_space<vmem>>, vector<4x8x8xf32>
      %50 = vector.broadcast %38 : vector<4x8x1xf32> to vector<4x8x8xf32>
      %51 = arith.mulf %50, %49 : vector<4x8x8xf32>
      %52 = arith.addf %51, %48 : vector<4x8x8xf32>
      %c0_33 = arith.constant 0 : index
      %c0_34 = arith.constant 0 : index
      %c0_35 = arith.constant 0 : index
      %53 = vector.load %arg10[%c0_33, %c0_34, %c0_35] : memref<4x8x8xf32, #tpu.memory_space<vmem>>, vector<4x8x8xf32>
      tpu.vector_store %arg10[%c0_33, %c0_34, %c0_35], %52 {strides = array<i32>} : memref<4x8x8xf32, #tpu.memory_space<vmem>>, vector<4x8x8xf32>,
      %c0_36 = arith.constant 0 : index
      %c0_37 = arith.constant 0 : index
      %c0_38 = arith.constant 0 : index
      %54 = vector.load %arg8[%c0_36, %c0_37, %c0_38] : memref<4x8x1xf32, #tpu.memory_space<vmem>>, vector<4x8x1xf32>
      tpu.vector_store %arg8[%c0_36, %c0_37, %c0_38], %36 {strides = array<i32>} : memref<4x8x1xf32, #tpu.memory_space<vmem>>, vector<4x8x1xf32>,
    } else {
    }
    %c1_i32 = arith.constant 1 : i32
    %10 = arith.cmpi eq, %arg2, %c1_i32 : i32
    %11 = arith.extui %10 : i1 to i32
    %c0_i32_3 = arith.constant 0 : i32
    %12 = arith.cmpi ne, %11, %c0_i32_3 : i32
    scf.if %12 {
      %c0 = arith.constant 0 : index
      %c0_4 = arith.constant 0 : index
      %c0_5 = arith.constant 0 : index
      %13 = vector.load %arg9[%c0, %c0_4, %c0_5] : memref<4x8x1xf32, #tpu.memory_space<vmem>>, vector<4x8x1xf32>
      %14 = tpu.reciprocal %13 {approx = true} : vector<4x8x1xf32> -> vector<4x8x1xf32>
      %c0_6 = arith.constant 0 : index
      %c0_7 = arith.constant 0 : index
      %c0_8 = arith.constant 0 : index
      %15 = vector.load %arg10[%c0_6, %c0_7, %c0_8] : memref<4x8x8xf32, #tpu.memory_space<vmem>>, vector<4x8x8xf32>
      %16 = vector.broadcast %14 : vector<4x8x1xf32> to vector<4x8x8xf32>
      %17 = arith.mulf %15, %16 : vector<4x8x8xf32>
      %c0_9 = arith.constant 0 : index
      %c0_10 = arith.constant 0 : index
      %c0_11 = arith.constant 0 : index
      %c0_12 = arith.constant 0 : index
      %18 = vector.load %arg6[%c0_9, %c0_10, %c0_11, %c0_12] : memref<1x4x8x8xf32, #tpu.memory_space<vmem>>, vector<1x4x8x8xf32>
      %19 = vector.shape_cast %18 : vector<1x4x8x8xf32> to vector<4x8x8xf32>
      %20 = vector.shape_cast %17 : vector<4x8x8xf32> to vector<1x4x8x8xf32>
      tpu.vector_store %arg6[%c0_9, %c0_10, %c0_11, %c0_12], %20 {strides = array<i32>} : memref<1x4x8x8xf32, #tpu.memory_space<vmem>>, vector<1x4x8x8xf32>,
    } else {
    }
    return
  }
  func.func @transform_0(%arg0: i32, %arg1: i32, %arg2: i32) -> (i32, i32, i32, i32) {
    %c0_i32 = arith.constant 0 : i32
    %c0_i32_0 = arith.constant 0 : i32
    %c0_i32_1 = arith.constant 0 : i32
    return %arg0, %c0_i32, %arg1, %c0_i32_0 : i32, i32, i32, i32
  }
  func.func @transform_1(%arg0: i32, %arg1: i32, %arg2: i32) -> (i32, i32, i32, i32) {
    %c0_i32 = arith.constant 0 : i32
    %c0_i32_0 = arith.constant 0 : i32
    %c0_i32_1 = arith.constant 0 : i32
    return %arg0, %c0_i32, %arg2, %c0_i32_0 : i32, i32, i32, i32
  }
  func.func @transform_2(%arg0: i32, %arg1: i32, %arg2: i32) -> (i32, i32, i32, i32) {
    %c0_i32 = arith.constant 0 : i32
    %c0_i32_0 = arith.constant 0 : i32
    %c0_i32_1 = arith.constant 0 : i32
    return %arg0, %c0_i32, %arg2, %c0_i32_0 : i32, i32, i32, i32
  }
  func.func @transform_3(%arg0: i32, %arg1: i32, %arg2: i32) -> (i32, i32, i32, i32) {
    %c0_i32 = arith.constant 0 : i32
    %c0_i32_0 = arith.constant 0 : i32
    %c0_i32_1 = arith.constant 0 : i32
    return %arg0, %c0_i32, %arg1, %c0_i32_0 : i32, i32, i32, i32
  }
}

</mosaic_0001>

<bundles_post_ra>
// kernel: exllama_attention_forward.1
= control target key start
LH: loop header
LB: loop body
LE: loop exit
PB: predicated region body
PF: predicated region fallthrough
CT: control target
= control target key end

     0   :  { %s1585_s12 = smov 0   ;;  %s1587_s13 = smov 0   ;;  %s1796_s0 = inlined_call_operand.vmem [shape: f32[2,4,8,8], index: 0, kind: input, shape index: {}]   ;;  %s1797_s1 = inlined_call_operand.vmem [shape: f32[2,4,32,8], index: 1, kind: input, shape index: {}]   ;;  %s1798_s2 = inlined_call_operand.vmem [shape: f32[2,4,32,8], index: 2, kind: input, shape index: {}]   ;;  %s1799_s3 = inlined_call_operand.vmem [shape: f32[2,4,8,8], index: 3, kind: output, shape index: {}]  }
   0x1   :  { %s1589_s14 = smov 0   ;;  %s1591_s15 = smov 0  }
   0x2   :  { %s1593_s16 = smov 0   ;;  %s1595_s17 = smov 0  }
   0x3   :  { %s1597_s18 = smov 0  }
   0x4 LB: > { %s25_s19 = sadd.s32 1, %s1549_s16  ;;  %s32_s20 = sadd.s32 1, %s1553_s17  ;;  %s1557_s18 = sphi %s1597_s18, %s13_s18   ;;  %s1553_s17 = sphi %s1595_s17, %s1806_s17   ;;  %s1549_s16 = sphi %s1593_s16, %s1805_s16   ;;  %s1545_s15 = sphi %s1591_s15, %s1804_s15   ;;  %s1541_s14 = sphi %s1589_s14, %s1803_s14   ;;  %s1537_s13 = sphi %s1587_s13, %s1802_s13   ;;  %s1533_s12 = sphi %s1585_s12, %s1801_s12  }
   0x5   : > { %p26_p0 = scmp.ge.s32.totalorder %s25_s19, 2  ;;  %p76_p1 = scmp.ne.s32.totalorder %s1537_s13, %s1533_s12 }
   0x6   : > { %p77_p2 = scmp.eq.s32.totalorder %s1557_s18, 0  ;;  %s69_s25 = sadd.s32 1, %s1537_s13 }
   0x7   : > { %s1808_s19 = smov (%p26_p0, %s25_s19), 0  ;;  %s1810_s20 = smov (!%p26_p0, %s32_s20), %s1553_s17 }
   0x8   : > { %p1628_p3 = por %p77_p2, %p76_p1  ;;  %p34_p4 = scmp.ge.s32.totalorder %s1810_s20, 2 }
   0x9   : > { %s65_s22 = ssub.s32 %s1549_s16, %s1808_s19  ;;  %p1323_p6 = scmp.ge.s32.totalorder %s1557_s18, 4 }
   0xa   : > { %s1812_s20 = smov (%p34_p4, %s1810_s20), 0 }
   0xb   : > { %s64_s23 = ssub.s32 %s1553_s17, %s1812_s20  ;;  %158 = sbr.rel (%p1323_p6) target bundleno = 36 (0x24), region = 16 }
   0xc   : > { %s66_s24 = sor.u32 %s65_s22, %s64_s23 }
   0xd   : > { %p67_p5 = scmp.eq.s32.totalorder %s66_s24, 0 }
   0xf   : > { %s1640_s26 = scalar_select %p67_p5, %s1537_s13, %s69_s25  }
  0x10   : > { %172 = sbr.rel (!%p1628_p3) target bundleno = 26 (0x1a), region = 24  ;;  %s174_s27 = sand.u32 (%p1628_p3), 1, %s1537_s13  }
  0x11   : > { %s1325_s28 = sshll.u32 (%p1628_p3), %s1553_s17, 4  ;;  %s1324_s29 = sshll.u32 (%p1628_p3), %s174_s27, 5 }
  0x12   : > { %s178_s30 = sadd.s32 (%p1628_p3), %s1549_s16, %s1325_s28  ;;  %s176_s8 = scalar_lea.vmem (%p1628_p3), [#allocation6], %s1324_s29 }
  0x13   : > { %s1326_s4 = sshll.u32 (%p1628_p3), %s178_s30, 3 }
  0x14   : > { %s180_s7 = scalar_lea.vmem (%p1628_p3), %s1797_s1, %s1326_s4 }
  0x15   : > { %v215_v0 = vld [vmem:[%s180_s7] sm:$0xff] }
  0x16   : > { %v217_v1 = vld [vmem:[%s180_s7 + $0x20] sm:$0xff]  ;;  %216 = vst [vmem:[%s176_s8] sm:$0xff] %v215_v0 }
  0x17   : > { %v219_v2 = vld [vmem:[%s180_s7 + $0x40] sm:$0xff]  ;;  %218 = vst [vmem:[%s176_s8 + $0x8] sm:$0xff] %v217_v1 }
  0x18   : > { %220 = vst [vmem:[%s176_s8 + $0x10] sm:$0xff] %v219_v2  ;;  %v221_v3 = vld [vmem:[%s180_s7 + $0x60] sm:$0xff] }
  0x19   : > { %222 = vst [vmem:[%s176_s8 + $0x18] sm:$0xff] %v221_v3 }
  0x1a PF: > { %228 = sbr.rel (!%p1628_p3) target bundleno = 36 (0x24), region = 62  ;;  %s230_s9 = sand.u32 (%p1628_p3), 1, %s1537_s13  }
  0x1b   : > { %s1328_s10 = sshll.u32 (%p1628_p3), %s1553_s17, 4  ;;  %s1327_s11 = sshll.u32 (%p1628_p3), %s230_s9, 5 }
  0x1c   : > { %s234_s22 = sadd.s32 (%p1628_p3), %s1549_s16, %s1328_s10  ;;  %s232_s28 = scalar_lea.vmem (%p1628_p3), [#allocation7], %s1327_s11 }
  0x1d   : > { %s1329_s23 = sshll.u32 (%p1628_p3), %s234_s22, 3 }
  0x1e   : > { %s236_s27 = scalar_lea.vmem (%p1628_p3), %s1798_s2, %s1329_s23 }
  0x1f   : > { %v271_v4 = vld [vmem:[%s236_s27] sm:$0xff] }
  0x20   : > { %v273_v5 = vld [vmem:[%s236_s27 + $0x20] sm:$0xff]  ;;  %272 = vst [vmem:[%s232_s28] sm:$0xff] %v271_v4 }
  0x21   : > { %v275_v6 = vld [vmem:[%s236_s27 + $0x40] sm:$0xff]  ;;  %274 = vst [vmem:[%s232_s28 + $0x8] sm:$0xff] %v273_v5 }
  0x22   : > { %276 = vst [vmem:[%s232_s28 + $0x10] sm:$0xff] %v275_v6  ;;  %v277_v7 = vld [vmem:[%s236_s27 + $0x60] sm:$0xff] }
  0x23   : > { %278 = vst [vmem:[%s232_s28 + $0x18] sm:$0xff] %v277_v7 }
  0x24 PF: > { %p1330_p7 = scmp.ge.s32.totalorder %s1557_s18, 1  ;;  %p283_p8 = scmp.lt.s32.totalorder %s1557_s18, 5 }
  0x26   : > { %p284_p9 = pnand %p1330_p7, %p283_p8 }
  0x27   : > { %s290_s21 = sand.u32 (!%p284_p9), 1, %s1533_s12   ;;  %p335_p10 = scmp.lt.s32.totalorder (!%p284_p9), %s1545_s15, 1 }
  0x28   : > { %287 = sbr.rel (%p284_p9) target bundleno = 912 (0x390), region = 100  ;;  %s1331_s29 = sshll.u32 (!%p284_p9), %s290_s21, 5 }
  0x29   : > { %s1672_s10 = scalar_lea.vmem (!%p284_p9), [#allocation6], %s1331_s29  ;;  %s1674_s11 = scalar_lea.vmem (!%p284_p9), [#allocation7], %s1331_s29 }
  0x2a   : > { %p1337_p11 = scmp.ne.s32.totalorder (!%p284_p9), %s1541_s14, 0 }
  0x2d   : > { %s1814_s15 = smov (!%p335_p10, %s1545_s15), 1  ;;  %354 = sbr.rel (%p1337_p11) target bundleno = 60 (0x3c), region = 112 }
  0x2e   : > { %s1355_s30 = sshll.u32 %s1814_s15, 5 }
  0x2f   : > { %s342_s6 = scalar_lea.vmem %s1796_s0, %s1355_s30  ;;  %s1670_s9 = scalar_lea.vmem %s1799_s3, %s1355_s30 }
  0x32   : > { %v355_v8 = vld [vmem:[%s342_s6] sm:$0xff]  ;;  %vm363_vm0 = vcmask 64512   ;;  %v356_v9 = vld [vmem:[%s342_s6 + $0x8] sm:$0xff]  ;;  %v357_v10 = vld [vmem:[%s342_s6 + $0x10] sm:$0xff]  ;;  %vm368_vm1 = vcmask 7168   ;;  %v1559_v14 = vmov -inf  }
  0x33   : > { %v359_v11 = vmul.f32 0.35355338, %v355_v8  ;;  %v360_v12 = vmul.f32 0.35355338, %v356_v9  ;;  %v361_v13 = vmul.f32 0.35355338, %v357_v10 }
  0x34   : > { %369 = vst.msk [vmem:[#allocation3] sm:$0xff] %vm368_vm1, %v1559_v14  ;;  %370 = vst.msk [vmem:[#allocation3 + $0x8] sm:$0xff] %vm368_vm1, %v1559_v14  ;;  %v358_v15 = vld [vmem:[%s342_s6 + $0x18] sm:$0xff]  ;;  %v1560_v17 = vmov 0.0  }
  0x35   : > { %371 = vst.msk [vmem:[#allocation3 + $0x10] sm:$0xff] %vm368_vm1, %v1559_v14  ;;  %372 = vst.msk [vmem:[#allocation3 + $0x18] sm:$0xff] %vm368_vm1, %v1559_v14  ;;  %v362_v16 = vmul.f32 0.35355338, %v358_v15 }
  0x36   : > { %364 = vst.msk [vmem:[#allocation2] sm:$0xff] %vm363_vm0, %v359_v11  ;;  %365 = vst.msk [vmem:[#allocation2 + $0x8] sm:$0xff] %vm363_vm0, %v360_v12 }
  0x37   : > { %366 = vst.msk [vmem:[#allocation2 + $0x10] sm:$0xff] %vm363_vm0, %v361_v13  ;;  %377 = vst.msk [vmem:[#allocation5] sm:$0xff] %vm363_vm0, %v1560_v17 }
  0x38   : > { %373 = vst.msk [vmem:[#allocation4] sm:$0xff] %vm368_vm1, %v1560_v17  ;;  %374 = vst.msk [vmem:[#allocation4 + $0x8] sm:$0xff] %vm368_vm1, %v1560_v17 }
  0x39   : > { %375 = vst.msk [vmem:[#allocation4 + $0x10] sm:$0xff] %vm368_vm1, %v1560_v17  ;;  %376 = vst.msk [vmem:[#allocation4 + $0x18] sm:$0xff] %vm368_vm1, %v1560_v17 }
  0x3a   : > { %378 = vst.msk [vmem:[#allocation5 + $0x8] sm:$0xff] %vm363_vm0, %v1560_v17  ;;  %379 = vst.msk [vmem:[#allocation5 + $0x10] sm:$0xff] %vm363_vm0, %v1560_v17 }
  0x3b   : > { %380 = vst.msk [vmem:[#allocation5 + $0x18] sm:$0xff] %vm363_vm0, %v1560_v17  ;;  %367 = vst.msk [vmem:[#allocation2 + $0x18] sm:$0xff] %vm363_vm0, %v362_v16 }
  0x3c PF: > { %s1338_s12 = sshll.u32 %s1541_s14, 3 }
  0x3d   : > { %p1339_p12 = scmp.gt.s32.totalorder %s1338_s12, 11 }
  0x3f   : > { %387 = sbr.rel (%p1339_p12) target bundleno = 758 (0x2f6), region = 116 }
  0x44   : > { %v392_v18 = vld [vmem:[%s1672_s10] sm:$0xff]  ;;  %vm400_vm2 = vcmask 64512   ;;  %v393_v19 = vld [vmem:[%s1672_s10 + $0x8] sm:$0xff]  ;;  %v1561_v20 = vmov 0.0   ;;  %vm1562_vm3 = vmmov 0   ;;  %v394_v23 = vld [vmem:[%s1672_s10 + $0x10] sm:$0xff]  ;;  %v706_v27 = vlaneseq }
  0x45   : > { %1373 = vmatprep.subr.mxu0 %v1561_v20  ;;  %1378 = vmatprep.subr.mxu1 %v1561_v20  ;;  %v388_v21 = vld [vmem:[#allocation2] sm:$0xff]  ;;  %v389_v22 = vld [vmem:[#allocation2 + $0x8] sm:$0xff]  ;;  %v395_v24 = vld [vmem:[%s1672_s10 + $0x18] sm:$0xff]  ;;  %v712_v30 = vstv %s1338_s12  ;;  %v1563_v49 = vmov 0   ;;  %vm809_vm5 = vcmask 7168  }
  0x46   : > { %1374 = vmatpush3.xpose.msk.msra.mxu0 %vm400_vm2, %v392_v18  ;;  %1375 = vmatprep.mubr.msk.f32.mxu0 %vm1562_vm3, %v1561_v20  ;;  %v390_v25 = vld [vmem:[#allocation2 + $0x10] sm:$0xff]  ;;  %v391_v26 = vld [vmem:[#allocation2 + $0x18] sm:$0xff]  ;;  %v707_v28 = vshrl.u32 %v706_v27, 7  ;;  %v711_v29 = vand.u32 127, %v706_v27  ;;  %v721_v50 = vld [vmem:[#allocation3] sm:$0xff] }
  0x47   : > { %1379 = vmatpush3.xpose.msk.msra.mxu1 %vm400_vm2, %v393_v19  ;;  %1380 = vmatprep.mubr.msk.f32.mxu1 %vm1562_vm3, %v1561_v20  ;;  %v1732_v53 = vld [vmem:[#allocation3 + $0x8] sm:$0xff]  ;;  %v723_v54 = vld [vmem:[#allocation3 + $0x10] sm:$0xff]  ;;  %v1736_v61 = vld [vmem:[#allocation3 + $0x18] sm:$0xff] }
  0x48   : > { %1383 = vmatprep.subr.mxu0 %v1561_v20  ;;  %1388 = vmatprep.subr.mxu1 %v1561_v20  ;;  %v709_v31 = vadd.s32 4, %v707_v28  ;;  %v713_v32 = vadd.s32 %v712_v30, %v711_v29  ;;  %v396_v3 = vld [vmem:[%s1674_s11] sm:$0xff]  ;;  %v397_v4 = vld [vmem:[%s1674_s11 + $0x8] sm:$0xff]  ;;  %v398_v18 = vld [vmem:[%s1674_s11 + $0x10] sm:$0xff] }
  0x49   : > { %1376 = vmatmul.mubr.msk.f32.vlgmr.msra.gmra.mxu0 %vm400_vm2, %v388_v21  ;;  %1475 = vset.pattern.permute.xlu0 %v1563_v49 }
  0x4a   : > { %1381 = vmatmul.mubr.msk.f32.vlgmr.msra.gmra.mxu1 %vm400_vm2, %v389_v22  ;;  %1384 = vmatpush3.xpose.msk.msra.mxu0 %vm400_vm2, %v394_v23  ;;  %vm714_vm4 = vcmp.le.s32.totalorder %v713_v32, %v709_v31  ;;  %v399_v23 = vld [vmem:[%s1674_s11 + $0x18] sm:$0xff] }
  0x4b   : > { %1385 = vmatprep.mubr.msk.f32.mxu0 %vm1562_vm3, %v1561_v20  ;;  %1389 = vmatpush3.xpose.msk.msra.mxu1 %vm400_vm2, %v395_v24 }
  0x4c   : > { %1390 = vmatprep.mubr.msk.f32.mxu1 %vm1562_vm3, %v1561_v20  ;;  %1393 = vmatprep.subr.mxu0 %v1561_v20 }
  0x4d   : > { %1386 = vmatmul.mubr.msk.f32.vlgmr.msra.gmra.mxu0 %vm400_vm2, %v390_v25  ;;  %1398 = vmatprep.subr.mxu1 %v1561_v20 }
  0x4e   : > { %1391 = vmatmul.mubr.msk.f32.vlgmr.msra.gmra.mxu1 %vm400_vm2, %v391_v26  ;;  %1395 = vmatprep.mubr.msk.f32.mxu0 %vm1562_vm3, %v1561_v20 }
  0x4f   : > { %1400 = vmatprep.mubr.msk.f32.mxu1 %vm1562_vm3, %v1561_v20  ;;  %1476 = vset.pattern.permute.xlu1 %v1563_v49  ;;  %v788_v49 = vld [vmem:[#allocation4 + $0x18] sm:$0xff] }
  0x50   : > { %1394 = vmatpush3.msra.mxu0 %v396_v3  ;;  %1399 = vmatpush3.msra.mxu1 %v397_v4 }
  0x51   : > { %1403 = vmatprep.subr.mxu0 %v1561_v20  ;;  %1408 = vmatprep.subr.mxu1 %v1561_v20 }
 0x109   : > { %v473_v33 = vpop.f32.mrf.mxu0 }
 0x10a   : > { %v717_v34 = vsel %vm714_vm4, %v473_v33, -1e+30  ;;  %v549_v35 = vpop.f32.mrf.mxu1 }
 0x10b   : > { %v1377_v36 = vpop.f32.mrf.mxu0  ;;  %v718_v37 = vsel %vm714_vm4, %v549_v35, -1e+30  ;;  %v725_v38 = vsel %vm400_vm2, %v717_v34, -inf  ;;  %v785_v35 = vld [vmem:[#allocation4] sm:$0xff] }
 0x10c   : > { %726 = vmax.xlane.f32.xlu0 %v725_v38  ;;  %v1382_v39 = vpop.f32.mrf.mxu1  ;;  %v728_v41 = vsel %vm400_vm2, %v718_v37, -inf  ;;  %v786_v38 = vld [vmem:[#allocation4 + $0x8] sm:$0xff] }
 0x10d   : > { %v625_v40 = vpop.f32.mrf.mxu0 }
 0x10e   : > { %v719_v42 = vsel %vm714_vm4, %v625_v40, -1e+30  ;;  %v701_v43 = vpop.f32.mrf.mxu1 }
 0x10f   : > { %v1387_v44 = vpop.f32.mrf.mxu0  ;;  %v720_v45 = vsel %vm714_vm4, %v701_v43, -1e+30  ;;  %v731_v46 = vsel %vm400_vm2, %v719_v42, -inf }
 0x110   : > { %729 = vmax.xlane.f32.xlu0 %v728_v41  ;;  %732 = vmax.xlane.f32.xlu1 %v731_v46  ;;  %v1392_v47 = vpop.f32.mrf.mxu1  ;;  %v734_v48 = vsel %vm400_vm2, %v720_v45, -inf  ;;  %v787_v44 = vld [vmem:[#allocation4 + $0x10] sm:$0xff] }
 0x114   : > { %735 = vmax.xlane.f32.xlu1 %v734_v48 }
 0x195   : > { %v727_v51 = vpop.xlane.xlu0 %726 }
 0x196   : > { %v737_v52 = vmax.f32 %v721_v50, %v727_v51 }
 0x198   : > { %v741_v55 = vsub.f32 %v721_v50, %v737_v52  ;;  %1142 = vst.msk [vmem:[#allocation3] sm:$0xff] %vm809_vm5, %v737_v52  ;;  %755 = vperm.xlu0 %1475, %v737_v52   ;;  %v1107_v50 = vld [vmem:[#allocation5 + $0x8] sm:$0xff] }
 0x199   : > { %v730_v56 = vpop.xlane.xlu0 %729  ;;  %v733_v57 = vpop.xlane.xlu1 %732 }
 0x19a   : > { %v745_v58 = vmul.f32 1.442695, %v741_v55  ;;  %v738_v59 = vmax.f32 %v1732_v53, %v730_v56  ;;  %v739_v60 = vmax.f32 %v723_v54, %v733_v57 }
 0x19c   : > { %1477 = vpow2.f32 %v745_v58  ;;  %v742_v62 = vsub.f32 %v1732_v53, %v738_v59  ;;  %1143 = vst.msk [vmem:[#allocation3 + $0x8] sm:$0xff] %vm809_vm5, %v738_v59  ;;  %760 = vperm.xlu1 %1476, %v738_v59   ;;  %v743_v63 = vsub.f32 %v723_v54, %v739_v60  ;;  %1144 = vst.msk [vmem:[#allocation3 + $0x10] sm:$0xff] %vm809_vm5, %v739_v60  ;;  %v1108_v59 = vld [vmem:[#allocation5 + $0x10] sm:$0xff] }
 0x19d   : > { %v736_v0 = vpop.xlane.xlu1 %735 }
 0x19e   : > { %v740_v1 = vmax.f32 %v1736_v61, %v736_v0  ;;  %v749_v21 = vmul.f32 1.442695, %v743_v63  ;;  %v747_v27 = vmul.f32 1.442695, %v742_v62 }
 0x1a0   : > { %765 = vperm.xlu1 %1476, %v739_v60   ;;  %v744_v2 = vsub.f32 %v1736_v61, %v740_v1  ;;  %1145 = vst.msk [vmem:[#allocation3 + $0x18] sm:$0xff] %vm809_vm5, %v740_v1 }
 0x1a2   : > { %v751_v32 = vmul.f32 1.442695, %v744_v2 }
 0x1a4   : > { %770 = vperm.xlu1 %1476, %v740_v1   ;;  %v1109_v1 = vld [vmem:[#allocation5 + $0x18] sm:$0xff] }
 0x1a9   : > { %v1478_v5 = vpop.eup %1477 }
 0x1aa   : > { %1112 = vperm.xlu1 %1476, %v1478_v5   ;;  %v789_v36 = vmul.f32 %v1478_v5, %v785_v35 }
 0x213   : > { %v756_v6 = vpop.permute.xlu0 %755 }
 0x214   : > { %v773_v7 = vsub.f32 %v717_v34, %v756_v6 }
 0x216   : > { %v777_v8 = vmul.f32 1.442695, %v773_v7 }
 0x217   : > { %v761_v9 = vpop.permute.xlu1 %760 }
 0x218   : > { %1479 = vpow2.f32 %v777_v8  ;;  %v774_v10 = vsub.f32 %v718_v37, %v761_v9 }
 0x21a   : > { %v779_v11 = vmul.f32 1.442695, %v774_v10 }
 0x21b   : > { %v766_v12 = vpop.permute.xlu1 %765 }
 0x21c   : > { %1481 = vpow2.f32 %v779_v11  ;;  %v775_v13 = vsub.f32 %v719_v42, %v766_v12 }
 0x21e   : > { %v781_v14 = vmul.f32 1.442695, %v775_v13 }
 0x21f   : > { %v771_v15 = vpop.permute.xlu1 %770 }
 0x220   : > { %1483 = vpow2.f32 %v781_v14  ;;  %v776_v16 = vsub.f32 %v720_v45, %v771_v15  ;;  %v1106_v45 = vld [vmem:[#allocation5] sm:$0xff] }
 0x222   : > { %v783_v17 = vmul.f32 1.442695, %v776_v16 }
 0x224   : > { %1485 = vpow2.f32 %v783_v17 }
 0x225   : > { %v1480_v19 = vpop.eup %1479  ;;  %1487 = vpow2.f32 %v749_v21  ;;  %v1113_v34 = vpop.permute.xlu1 %1112 }
 0x226   : > { %1396 = vmatmul.mubr.msk.f32.vlgmr.msra.gmra.mxu0 %vm400_vm2, %v1480_v19  ;;  %v793_v22 = vsel %vm400_vm2, %v1480_v19, 0.0  ;;  %1489 = vpow2.f32 %v747_v27  ;;  %v1130_v47 = vmul.f32 %v1113_v34, %v1106_v45 }
 0x227   : > { %794 = vadd.xlane.f32.xlu1 %v793_v22  ;;  %1404 = vmatpush3.msra.mxu0 %v398_v18  ;;  %1491 = vpow2.f32 %v751_v32 }
 0x228   : > { %1405 = vmatprep.mubr.msk.f32.mxu0 %vm1562_vm3, %v1561_v20 }
 0x229   : > { %v1482_v24 = vpop.eup %1481 }
 0x22a   : > { %1401 = vmatmul.mubr.msk.f32.vlgmr.msra.gmra.mxu1 %vm400_vm2, %v1482_v24  ;;  %v796_v25 = vsel %vm400_vm2, %v1482_v24, 0.0 }
 0x22b   : > { %797 = vadd.xlane.f32.xlu0 %v796_v25  ;;  %1409 = vmatpush3.msra.mxu1 %v399_v23 }
 0x22c   : > { %1410 = vmatprep.mubr.msk.f32.mxu1 %vm1562_vm3, %v1561_v20 }
 0x22d   : > { %v1484_v26 = vpop.eup %1483 }
 0x22e   : > { %1406 = vmatmul.mubr.msk.f32.vlgmr.msra.gmra.mxu0 %vm400_vm2, %v1484_v26  ;;  %v799_v31 = vsel %vm400_vm2, %v1484_v26, 0.0 }
 0x231   : > { %v1486_v28 = vpop.eup %1485 }
 0x232   : > { %1411 = vmatmul.mubr.msk.f32.vlgmr.msra.gmra.mxu1 %vm400_vm2, %v1486_v28  ;;  %v1488_v29 = vpop.eup %1487  ;;  %v802_v33 = vsel %vm400_vm2, %v1486_v28, 0.0 }
 0x233   : > { %v1490_v30 = vpop.eup %1489  ;;  %v791_v46 = vmul.f32 %v1488_v29, %v787_v44 }
 0x234   : > { %v1492_v20 = vpop.eup %1491  ;;  %v790_v40 = vmul.f32 %v1490_v30, %v786_v38 }
 0x235   : > { %v792_v56 = vmul.f32 %v1492_v20, %v788_v49 }
 0x238   : > { %1122 = vperm.xlu1 %1476, %v1488_v29  }
 0x241   : > { %1117 = vperm.xlu0 %1475, %v1490_v30  }
 0x25c   : > { %800 = vadd.xlane.f32.xlu1 %v799_v31 }
 0x260   : > { %803 = vadd.xlane.f32.xlu1 %v802_v33 }
 0x271   : > { %1127 = vperm.xlu1 %1476, %v1492_v20  }
 0x2b0   : > { %v795_v37 = vpop.xlane.xlu1 %794 }
 0x2b1   : > { %v805_v39 = vadd.f32 %v795_v37, %v789_v36 }
 0x2b3   : > { %810 = vst.msk [vmem:[#allocation4] sm:$0xff] %vm809_vm5, %v805_v39 }
 0x2b4   : > { %v798_v41 = vpop.xlane.xlu0 %797  ;;  %v1123_v43 = vpop.permute.xlu1 %1122 }
 0x2b5   : > { %v806_v42 = vadd.f32 %v798_v41, %v790_v40  ;;  %v1132_v0 = vmul.f32 %v1123_v43, %v1108_v59 }
 0x2b7   : > { %811 = vst.msk [vmem:[#allocation4 + $0x8] sm:$0xff] %vm809_vm5, %v806_v42 }
 0x2bc   : > { %v1118_v51 = vpop.permute.xlu0 %1117 }
 0x2bd   : > { %v1131_v57 = vmul.f32 %v1118_v51, %v1107_v50 }
 0x2e5   : > { %v801_v48 = vpop.xlane.xlu1 %800 }
 0x2e6   : > { %v807_v52 = vadd.f32 %v801_v48, %v791_v46  ;;  %v883_v53 = vpop.f32.mrf.mxu0 }
 0x2e7   : > { %v1134_v54 = vadd.f32 %v1130_v47, %v883_v53 }
 0x2e8   : > { %812 = vst.msk [vmem:[#allocation4 + $0x10] sm:$0xff] %vm809_vm5, %v807_v52  ;;  %v1397_v55 = vpop.f32.mrf.mxu0 }
 0x2e9   : > { %1138 = vst.msk [vmem:[#allocation5] sm:$0xff] %vm400_vm2, %v1134_v54  ;;  %v804_v58 = vpop.xlane.xlu1 %803 }
 0x2ea   : > { %v808_v60 = vadd.f32 %v804_v58, %v792_v56  ;;  %v956_v61 = vpop.f32.mrf.mxu1 }
 0x2eb   : > { %v1135_v62 = vadd.f32 %v1131_v57, %v956_v61 }
 0x2ec   : > { %813 = vst.msk [vmem:[#allocation4 + $0x18] sm:$0xff] %vm809_vm5, %v808_v60  ;;  %v1402_v63 = vpop.f32.mrf.mxu1 }
 0x2ed   : > { %1139 = vst.msk [vmem:[#allocation5 + $0x8] sm:$0xff] %vm400_vm2, %v1135_v62  ;;  %v1128_v2 = vpop.permute.xlu1 %1127 }
 0x2ee   : > { %v1029_v3 = vpop.f32.mrf.mxu0  ;;  %v1133_v6 = vmul.f32 %v1128_v2, %v1109_v1 }
 0x2ef   : > { %v1136_v4 = vadd.f32 %v1132_v0, %v1029_v3 }
 0x2f0   : > { %v1407_v5 = vpop.f32.mrf.mxu0 }
 0x2f1   : > { %1140 = vst.msk [vmem:[#allocation5 + $0x10] sm:$0xff] %vm400_vm2, %v1136_v4 }
 0x2f2   : > { %v1102_v7 = vpop.f32.mrf.mxu1 }
 0x2f3   : > { %v1137_v8 = vadd.f32 %v1133_v6, %v1102_v7 }
 0x2f4   : > { %v1412_v9 = vpop.f32.mrf.mxu1 }
 0x2f5   : > { %1141 = vst.msk [vmem:[#allocation5 + $0x18] sm:$0xff] %vm400_vm2, %v1137_v8 }
 0x2f6 PF: > { %p1352_p13 = scmp.ne.s32.totalorder %s1541_s14, 1 }
 0x2f8   : > { %1149 = sbr.rel (%p1352_p13) target bundleno = 912 (0x390), region = 120 }
 0x2fd   : > { %v1152_v10 = vld [vmem:[#allocation4 + $0x10] sm:$0xff]  ;;  %v1150_v11 = vld [vmem:[#allocation4] sm:$0xff]  ;;  %v1153_v12 = vld [vmem:[#allocation4 + $0x18] sm:$0xff]  ;;  %v1564_v13 = vmov 0   ;;  %vm1186_vm6 = vcmask 64512  }
 0x2fe   : > { %1494 = vset.pattern.permute.xlu1 %v1564_v13  ;;  %1493 = vset.pattern.permute.xlu0 %v1564_v13  ;;  %1495 = vrcp.f32 %v1152_v10  ;;  %v1151_v14 = vld [vmem:[#allocation4 + $0x8] sm:$0xff]  ;;  %v1160_v19 = vld [vmem:[#allocation5 + $0x10] sm:$0xff]  ;;  %v1158_v21 = vld [vmem:[#allocation5] sm:$0xff] }
 0x2ff   : > { %1497 = vrcp.f32 %v1150_v11  ;;  %v1161_v26 = vld [vmem:[#allocation5 + $0x18] sm:$0xff]  ;;  %v1159_v27 = vld [vmem:[#allocation5 + $0x8] sm:$0xff] }
 0x300   : > { %1499 = vrcp.f32 %v1153_v12 }
 0x301   : > { %1501 = vrcp.f32 %v1151_v14 }
 0x30b   : > { %v1496_v15 = vpop.eup %1495 }
 0x30c   : > { %v1498_v16 = vpop.eup %1497  ;;  %1174 = vperm.xlu1 %1494, %v1496_v15  }
 0x30d   : > { %v1500_v17 = vpop.eup %1499  ;;  %1164 = vperm.xlu0 %1493, %v1498_v16  }
 0x30e   : > { %v1502_v18 = vpop.eup %1501 }
 0x310   : > { %1179 = vperm.xlu1 %1494, %v1500_v17  }
 0x311   : > { %1169 = vperm.xlu0 %1493, %v1502_v18  }
 0x387   : > { %v1175_v22 = vpop.permute.xlu1 %1174 }
 0x388   : > { %v1184_v23 = vmul.f32 %v1175_v22, %v1160_v19  ;;  %v1165_v24 = vpop.permute.xlu0 %1164 }
 0x389   : > { %v1182_v25 = vmul.f32 %v1165_v24, %v1158_v21 }
 0x38a   : > { %1189 = vst.msk [vmem:[%s1670_s9 + $0x10] sm:$0xff] %vm1186_vm6, %v1184_v23 }
 0x38b   : > { %1187 = vst.msk [vmem:[%s1670_s9] sm:$0xff] %vm1186_vm6, %v1182_v25  ;;  %v1180_v28 = vpop.permute.xlu1 %1179 }
 0x38c   : > { %v1185_v29 = vmul.f32 %v1180_v28, %v1161_v26  ;;  %v1170_v30 = vpop.permute.xlu0 %1169 }
 0x38d   : > { %v1183_v31 = vmul.f32 %v1170_v30, %v1159_v27 }
 0x38e   : > { %1190 = vst.msk [vmem:[%s1670_s9 + $0x18] sm:$0xff] %vm1186_vm6, %v1185_v29 }
 0x38f   : > { %1188 = vst.msk [vmem:[%s1670_s9 + $0x8] sm:$0xff] %vm1186_vm6, %v1183_v31 }
 0x390 PF: > { %s13_s18 = sadd.s32 1, %s1557_s18   ;;  %s1801_s12 = smov %s1537_s13 }
 0x391   : > { %p10_p0 = scmp.ge.s32.totalorder %s13_s18, 6   ;;  %s1802_s13 = smov %s1640_s26 }
 0x392   : > { %s1803_s14 = smov %s1549_s16  ;;  %s1804_s15 = smov %s1553_s17 }
 0x393   : > { %s1805_s16 = smov %s1808_s19  ;;  %s1806_s17 = smov %s1812_s20 }
 0x394   :  { %12 = sbr.rel (!%p10_p0) target bundleno = 4 (0x4), region = 166 }

</bundles_post_ra>
